<compile_context>
chip_gen: v5e
topology: v5e:2x2
jax: 0.10.0
libtpu: 0.0.40
codegen_flags: <defaults>
</compile_context>

<pallas_src>
import jax
import jax.numpy as jnp
from jax.experimental import pallas as pl
from jax.experimental.pallas import tpu as pltpu


def _outconv_kernel(x_ref, w_ref, b_ref, o_ref):
    # x_ref: (Nb, C_in, TS)   w_ref: (C_out, C_in)   b_ref: (C_out, 1)
    # o_ref: (Nb, C_out, TS)
    nb = x_ref.shape[0]
    w = w_ref[...]
    b = b_ref[...]

    def step(i):
        acc = jnp.dot(w, x_ref[i], preferred_element_type=jnp.float32)
        o_ref[i] = (acc + b).astype(o_ref.dtype)

    if nb <= 8:
        # Small batch fold: static unroll.
        for i in range(nb):
            step(i)
    else:
        # Large batch fold: rolled loop (dynamic first-axis ref indexing).
        def body(i, carry):
            step(i)
            return carry

        jax.lax.fori_loop(0, nb, body, 0)


def _choose_tiling(N, C_in, C_out, HW, dtsize):
    """Pick (Nb, TS) from a bytes-per-step target and the VMEM budget."""
    try:
        vmem_cap = int(pltpu.get_tpu_info().vmem_capacity_bytes)
    except Exception:
        vmem_cap = 64 << 20  # conservative fallback: v7x physical VMEM

    # Bytes moved per grid step (input tile + output tile). Multi-MiB steps
    # amortize the ~0.35us/step overhead and reach the HBM roofline on
    # v5e/v6e/v7x; cap by VMEM so the double-buffered footprint stays small.
    target_step_bytes = min(8 << 20, vmem_cap // 8)

    col_bytes = (C_in + C_out) * dtsize            # bytes per (batch, pixel) column
    max_cols = max(1, target_step_bytes // col_bytes)  # Nb*TS budget per step

    if HW >= max_cols:
        # Big image: one batch element per step, tile the spatial (lane) dim.
        Nb = 1
        TS = min(HW, max(128, (max_cols // 128) * 128))
    else:
        # Small image: full HW on lanes, fold batches to fill the step.
        TS = HW
        Nb = max(1, min(N, max_cols // HW))

    # Keep enough grid steps for double-buffer overlap and both v7x cores —
    # but only when each step would still carry a substantial payload
    # (tiny problems are better off with fewer, fuller steps).
    min_steps = 8
    total_bytes = N * HW * col_bytes
    if total_bytes // min_steps >= (256 << 10):

        def steps(nb, ts):
            return (-(-N // nb)) * (-(-HW // ts))

        while Nb > 1 and steps(Nb, TS) < min_steps:
            Nb = max(1, Nb // 2)
        while TS >= 512 and TS % 128 == 0 and steps(Nb, TS) < min_steps:
            TS = max(256, ((TS // 2) // 128) * 128)

    return Nb, TS, vmem_cap


def outconv_pallas(x_nchw, weight, bias):
    """1x1 Conv2d forward (PyTorch OutConv).

    x_nchw : (N, C_in, H, W)
    weight : (C_out, C_in, 1, 1)   (PyTorch Conv2d layout)
    bias   : (C_out,)
    returns: (N, C_out, H, W)
    """
    N, C_in, H, W = x_nchw.shape
    C_out = weight.shape[0]
    HW = H * W
    dtsize = jnp.dtype(x_nchw.dtype).itemsize

    # Reshape-only layout changes (no HBM transpose traffic).
    x3 = x_nchw.reshape(N, C_in, HW)      # (N, C_in, HW)
    w_mat = weight.reshape(C_out, C_in)    # (C_out, C_in)
    b_col = bias.reshape(C_out, 1)         # (C_out, 1)

    Nb, TS, vmem_cap = _choose_tiling(N, C_in, C_out, HW, dtsize)
    grid = (pl.cdiv(N, Nb), pl.cdiv(HW, TS))

    # Double-buffered in+out tiles plus resident weight/bias; raise the
    # scoped-VMEM limit explicitly (v5e default is only 16 MiB) but never
    # beyond half of physical VMEM (generation-aware for v7x's 64 MiB).
    wb_dtsize = jnp.dtype(weight.dtype).itemsize
    step_bytes = Nb * (C_in + C_out) * TS * dtsize
    wb_bytes = (C_out * C_in + C_out) * wb_dtsize
    footprint = 2 * step_bytes + 2 * wb_bytes
    vmem_limit = int(min(vmem_cap // 2, max(2 * footprint, 32 << 20)))

    cost = pl.CostEstimate(
        flops=2 * N * HW * C_in * C_out,
        transcendentals=0,
        bytes_accessed=N * (C_in + C_out) * HW * dtsize + wb_bytes,
    )

    out3 = pl.pallas_call(
        _outconv_kernel,
        out_shape=jax.ShapeDtypeStruct((N, C_out, HW), x_nchw.dtype),
        grid_spec=pltpu.PrefetchScalarGridSpec(
            num_scalar_prefetch=0,
            grid=grid,
            in_specs=[
                # x: Nb batches, all input channels, one spatial tile.
                pl.BlockSpec((Nb, C_in, TS), lambda n, s: (n, 0, s)),
                # weight / bias stay resident (constant block index).
                pl.BlockSpec((C_out, C_in), lambda n, s: (0, 0)),
                pl.BlockSpec((C_out, 1), lambda n, s: (0, 0)),
            ],
            out_specs=pl.BlockSpec((Nb, C_out, TS), lambda n, s: (n, 0, s)),
        ),
        compiler_params=pltpu.CompilerParams(
            dimension_semantics=("parallel", "parallel"),
            vmem_limit_bytes=vmem_limit,
        ),
        cost_estimate=cost,
    )(x3, w_mat, b_col)

    return out3.reshape(N, C_out, H, W)


if __name__ == "__main__":
    key = jax.random.PRNGKey(0)
    k_x, k_w, k_b = jax.random.split(key, 3)

    N, C_in, C_out, H, W = 2, 4, 3, 16, 16

    x = jax.random.normal(k_x, (N, C_in, H, W), dtype=jnp.float32)
    # nn.Conv2d parameter layout: weight (C_out, C_in, 1, 1), bias (C_out,).
    weight = jax.random.normal(k_w, (C_out, C_in, 1, 1), dtype=jnp.float32) * 0.1
    bias = jax.random.normal(k_b, (C_out,), dtype=jnp.float32) * 0.1

    y = outconv_pallas(x, weight, bias)
    jax.block_until_ready(y)

    # Reference check (plain JAX 1x1 conv == channel matmul).
    y_ref = (
        jnp.einsum("nchw,oc->nohw", x, weight.reshape(C_out, C_in))
        + bias[None, :, None, None]
    )
    assert y.shape == (N, C_out, H, W)
    assert jnp.allclose(y, y_ref, atol=1e-5, rtol=1e-5)

    print("KERNEL_OK")
</pallas_src>

<mosaic_0001>
module attributes {stable_mosaic.version = 11 : i64} {
  func.func @_outconv_kernel(%arg0: i32, %arg1: i32, %arg2: memref<2x4x256xf32, #tpu.memory_space<vmem>>, %arg3: memref<3x4xf32, #tpu.memory_space<vmem>>, %arg4: memref<3x1xf32, #tpu.memory_space<vmem>>, %arg5: memref<2x3x256xf32, #tpu.memory_space<vmem>>) attributes {dimension_semantics = [#tpu.dimension_semantics<parallel>, #tpu.dimension_semantics<parallel>], iteration_bounds = array<i64: 1, 1>, scalar_prefetch = 0 : i64, scratch_operands = 0 : i64, tpu.core_type = #tpu.core_type<tc>, window_params = [{transform_indices = @transform_0, window_bounds = array<i64: 2, 4, 256>}, {pipeline_mode = #tpu.pipeline_mode<synchronous>, transform_indices = @transform_1, window_bounds = array<i64: 3, 4>}, {pipeline_mode = #tpu.pipeline_mode<synchronous>, transform_indices = @transform_2, window_bounds = array<i64: 3, 1>}, {transform_indices = @transform_3, window_bounds = array<i64: 2, 3, 256>}]} {
    %c0 = arith.constant 0 : index
    %c0_0 = arith.constant 0 : index
    %0 = vector.load %arg3[%c0, %c0_0] : memref<3x4xf32, #tpu.memory_space<vmem>>, vector<3x4xf32>
    %c0_1 = arith.constant 0 : index
    %c0_2 = arith.constant 0 : index
    %1 = vector.load %arg4[%c0_1, %c0_2] : memref<3x1xf32, #tpu.memory_space<vmem>>, vector<3x1xf32>
    %c0_3 = arith.constant 0 : index
    %c0_4 = arith.constant 0 : index
    %c0_5 = arith.constant 0 : index
    %2 = vector.load %arg2[%c0_3, %c0_4, %c0_5] : memref<2x4x256xf32, #tpu.memory_space<vmem>>, vector<1x4x256xf32>
    %3 = vector.shape_cast %2 : vector<1x4x256xf32> to vector<4x256xf32>
    %cst = arith.constant dense<0.000000e+00> : vector<3x256xf32>
    %4 = tpu.matmul %0, %3, %cst {dimension_numbers = #tpu.dot_dimension_numbers<[1], [0], [0], [1], [0, 0, 1, 1], [], []>} : vector<3x4xf32>, vector<4x256xf32>, vector<3x256xf32> -> vector<3x256xf32>
    %5 = vector.broadcast %1 : vector<3x1xf32> to vector<3x256xf32>
    %6 = arith.addf %4, %5 : vector<3x256xf32>
    %c0_6 = arith.constant 0 : index
    %c0_7 = arith.constant 0 : index
    %c0_8 = arith.constant 0 : index
    %7 = vector.load %arg5[%c0_6, %c0_7, %c0_8] : memref<2x3x256xf32, #tpu.memory_space<vmem>>, vector<1x3x256xf32>
    %8 = vector.shape_cast %7 : vector<1x3x256xf32> to vector<3x256xf32>
    %9 = vector.shape_cast %6 : vector<3x256xf32> to vector<1x3x256xf32>
    tpu.vector_store %arg5[%c0_6, %c0_7, %c0_8], %9 {strides = array<i32>} : memref<2x3x256xf32, #tpu.memory_space<vmem>>, vector<1x3x256xf32>,
    %c1 = arith.constant 1 : index
    %c0_9 = arith.constant 0 : index
    %c0_10 = arith.constant 0 : index
    %10 = vector.load %arg2[%c1, %c0_9, %c0_10] : memref<2x4x256xf32, #tpu.memory_space<vmem>>, vector<1x4x256xf32>
    %11 = vector.shape_cast %10 : vector<1x4x256xf32> to vector<4x256xf32>
    %cst_11 = arith.constant dense<0.000000e+00> : vector<3x256xf32>
    %12 = tpu.matmul %0, %11, %cst_11 {dimension_numbers = #tpu.dot_dimension_numbers<[1], [0], [0], [1], [0, 0, 1, 1], [], []>} : vector<3x4xf32>, vector<4x256xf32>, vector<3x256xf32> -> vector<3x256xf32>
    %13 = vector.broadcast %1 : vector<3x1xf32> to vector<3x256xf32>
    %14 = arith.addf %12, %13 : vector<3x256xf32>
    %c1_12 = arith.constant 1 : index
    %c0_13 = arith.constant 0 : index
    %c0_14 = arith.constant 0 : index
    %15 = vector.load %arg5[%c1_12, %c0_13, %c0_14] : memref<2x3x256xf32, #tpu.memory_space<vmem>>, vector<1x3x256xf32>
    %16 = vector.shape_cast %15 : vector<1x3x256xf32> to vector<3x256xf32>
    %17 = vector.shape_cast %14 : vector<3x256xf32> to vector<1x3x256xf32>
    tpu.vector_store %arg5[%c1_12, %c0_13, %c0_14], %17 {strides = array<i32>} : memref<2x3x256xf32, #tpu.memory_space<vmem>>, vector<1x3x256xf32>,
    return
  }
  func.func @transform_0(%arg0: i32, %arg1: i32) -> (i32, i32, i32) {
    %c0_i32 = arith.constant 0 : i32
    %c0_i32_0 = arith.constant 0 : i32
    return %arg0, %c0_i32, %arg1 : i32, i32, i32
  }
  func.func @transform_1(%arg0: i32, %arg1: i32) -> (i32, i32) {
    %c0_i32 = arith.constant 0 : i32
    %c0_i32_0 = arith.constant 0 : i32
    %c0_i32_1 = arith.constant 0 : i32
    return %c0_i32, %c0_i32_0 : i32, i32
  }
  func.func @transform_2(%arg0: i32, %arg1: i32) -> (i32, i32) {
    %c0_i32 = arith.constant 0 : i32
    %c0_i32_0 = arith.constant 0 : i32
    %c0_i32_1 = arith.constant 0 : i32
    return %c0_i32, %c0_i32_0 : i32, i32
  }
  func.func @transform_3(%arg0: i32, %arg1: i32) -> (i32, i32, i32) {
    %c0_i32 = arith.constant 0 : i32
    %c0_i32_0 = arith.constant 0 : i32
    return %arg0, %c0_i32, %arg1 : i32, i32, i32
  }
}

</mosaic_0001>

<bundles_post_ra>
// kernel: tpu_custom_call.1
= control target key start
LH: loop header
LB: loop body
LE: loop exit
PB: predicated region body
PF: predicated region fallthrough
CT: control target
= control target key end

     0   :  { %8 = vsyncpa [#allocation3], 0  ;;  %s199_s15 = smov [#allocation2]   ;;  %s200_s17 = smov 128   ;;  %s244_s0 = inlined_call_operand.hbm [shape: f32[2,4,256], index: 0, kind: input, shape index: {}]   ;;  %s245_s1 = inlined_call_operand.vmem [shape: f32[3,4], index: 1, kind: input, shape index: {}]   ;;  %s246_s2 = inlined_call_operand.vmem [shape: f32[3,1], index: 2, kind: input, shape index: {}]   ;;  %s247_s3 = inlined_call_operand.vmem [shape: f32[2,3,256], index: 3, kind: output, shape index: {}]  }
   0x1   :  { %s13_s14 = sshll.u32 %s244_s0, 4  ;;  %s15_s16 = sshll.u32 %s199_s15, 4  ;;  %s14_s14 = int_to_ptr.hbm [resolvable:$true] %s13_s14  ;;  %s16_s16 = int_to_ptr.vmem [resolvable:$true] %s15_s16 }
   0x2   :  { %s201_s18 = smov 8  }
   0x3   :  { %21 = dma.hbm_to_vmem [thread:$0]  %s14_s14, 256, %s16_s16, [#allocation3], %s200_s17, %s200_s17, %s201_s18  }
   0x4   :  { %197 = dma.done.wait [#allocation3], 256  }
   0x5   :  { %198 = vsyncadd [#allocation3], 4294967040  ;;  %v202_v0 = vmov 0   ;;  %v32_v1 = vld [vmem:[#allocation2] sm:$0xff]  ;;  %v31_v2 = vld [vmem:[%s246_s2] sm:$0x7] }
   0x6   :  { %172 = vset.pattern.permute.xlu0 %v202_v0  ;;  %39 = vst [vmem:[#allocation1] ss:$2 sm:$0xff] %v32_v1  ;;  %v98_v3 = vld [vmem:[#allocation2 + $0x8] sm:$0xff]  ;;  %vm46_vm0 = vcmask 1043456   ;;  %v30_v6 = vld [vmem:[%s245_s1] sm:$0x7] }
   0x7   :  { %35 = vperm.xlu0 %172, %v31_v2   ;;  %vm42_vm1 = vcmask 31744  }
   0xd   :  { %v40_v4 = vld.sshfl [vmem:[#allocation1] sm:$0xff pattern:$0x75316420]  ;;  %v41_v5 = vld.sshfl [vmem:[#allocation1 + $0x8] sm:$0xff pattern:$0x75316420] }
   0xe   :  { %100 = vst [vmem:[#allocation1] ss:$2 sm:$0xff] %v98_v3  ;;  %161 = vmatpush.msk.msra.mxu1 %vm46_vm0, %v41_v5  ;;  %159 = vmatpush.msk.msra.mxu0 %vm46_vm0, %v40_v4 }
   0xf   :  { %162 = vmatmul.msk.f32.vlgmr.msra.gmra.mxu1 %vm42_vm1, %v30_v6  ;;  %160 = vmatmul.msk.f32.vlgmr.msra.gmra.mxu0 %vm42_vm1, %v30_v6 }
  0x15   :  { %v101_v7 = vld.sshfl [vmem:[#allocation1] sm:$0xff pattern:$0x75316420]  ;;  %v102_v8 = vld.sshfl [vmem:[#allocation1 + $0x8] sm:$0xff pattern:$0x75316420] }
  0x16   :  { %163 = vmatpush.msk.msra.mxu2 %vm46_vm0, %v101_v7  ;;  %165 = vmatpush.msk.msra.mxu3 %vm46_vm0, %v102_v8 }
  0x17   :  { %164 = vmatmul.msk.f32.vlgmr.msra.gmra.mxu2 %vm42_vm1, %v30_v6  ;;  %166 = vmatmul.msk.f32.vlgmr.msra.gmra.mxu3 %vm42_vm1, %v30_v6 }
  0x79   :  { %v36_v9 = vpop.permute.xlu0 %35 }
  0x8c   :  { %v88_v10 = vpop.f32.mrf.mxu1  ;;  %v68_v11 = vpop.f32.mrf.mxu0 }
  0x8d   :  { %v89_v12 = vadd.f32 %v88_v10, %v36_v9  ;;  %v69_v13 = vadd.f32 %v68_v11, %v36_v9 }
  0x8f   :  { %v93_v14 = vrot.slane %v89_v12, 4 }
  0x91   :  { %v94_v15 = vsel %vm46_vm0, %v69_v13, %v93_v14 }
  0x92   :  { %96 = vst [vmem:[%s247_s3] sm:$0x77] %v94_v15 }
  0x9a   :  { %v124_v16 = vpop.f32.mrf.mxu2  ;;  %v144_v17 = vpop.f32.mrf.mxu3 }
  0x9b   :  { %v145_v18 = vadd.f32 %v144_v17, %v36_v9  ;;  %v125_v19 = vadd.f32 %v124_v16, %v36_v9 }
  0x9d   :  { %v149_v20 = vrot.slane %v145_v18, 4 }
  0x9f   :  { %v150_v21 = vsel %vm46_vm0, %v125_v19, %v149_v20 }
  0xa0   :  { %167 = vst [vmem:[%s247_s3 + $0x8] sm:$0x77] %v150_v21 }
  0xa1   :  { %158 = vsyncpa [#allocation3], 1 }

</bundles_post_ra>
